<compile_context>
chip_gen: v7x
topology: tpu7x:2x2x1
jax: 0.10.0
libtpu: 0.0.40
codegen_flags: <defaults>
</compile_context>

<pallas_src>
import math

import jax
import jax.numpy as jnp
from jax.experimental import pallas as pl
from jax.experimental.pallas import tpu as pltpu

_LANE = 128
_SUBLANE = 8

# Explicit VMEM accounting (review item 1): default scoped VMEM is only
# 16 MiB (v5e) / 32 MiB (v6e, v7x) and the batch axis cannot be tiled, so the
# footprint scales linearly with B.  Tiles are sized against a budget that
# includes the f32 score temporaries, and the scoped ceiling is raised -- but
# kept safely below v7x's 64 MiB physical VMEM.
_VMEM_BUDGET_BYTES = 36 * 1024 * 1024
_VMEM_LIMIT_BYTES = 48 * 1024 * 1024


def _round_up(x, m):
    return ((x + m - 1) // m) * m


def _plan_tiles(B, Sq, Sk, D, Dv, itemsize, budget):
    """Pick (tq, tk, Dp, Dvp, Sqp, Skp) under an explicit VMEM budget.

    - D / Dv are padded up to multiples of 128 so q/v tiles and the output
      store are lane-dense (unmasked vst, MXU-friendly N dim).
    - Sq / Sk are padded up to tile multiples instead of degrading to tiny
      divisor tiles (per-grid-step overhead ~0.35us).
    - tq is capped at ceil(Sq/2) when Sq allows so the 'parallel' axis has
      >= 2 blocks (v7x megacore keeps both TensorCores busy).
    - The batch axis cannot be split (softmax normalizes over it), so (tq, tk)
      are the only levers against the B-proportional footprint.
    """
    Dp = _round_up(D, _LANE)
    Dvp = _round_up(Dv, _LANE)
    sq_align = _round_up(Sq, _SUBLANE)
    sk_align = _round_up(Sk, _SUBLANE)

    # q-tile candidates: <= 256 (MXU M dim) and, when possible, <= ceil(Sq/2).
    tq_cap = min(256, sq_align)
    if sq_align >= 2 * _SUBLANE:
        tq_cap = min(tq_cap, _round_up(-(-Sq // 2), _SUBLANE))
    tq_cands = [t for t in (256, 128, 64, 32, 16, 8) if t <= tq_cap]
    if not tq_cands or tq_cands[0] != tq_cap:
        tq_cands = [tq_cap] + tq_cands

    # k-tile candidates: 128-multiples (lane-dense score slab / k tile lanes);
    # tiny Sk falls back to a single full-extent block.
    if sk_align <= _LANE:
        tk_cands = [sk_align]
    else:
        tk_cands = [t for t in (512, 256, 128) if t <= _round_up(Sk, _LANE)]

    def footprint(tq, tk):
        q_b = B * tq * Dp * itemsize * 3          # 2 pipeline bufs + scaled-q scratch
        k_b = B * Dp * tk * itemsize * 2          # double-buffered
        v_b = B * tk * Dvp * itemsize * 2
        o_b = B * tq * Dvp * itemsize * 2
        acc_b = B * tq * Dvp * 4
        score_b = 2 * B * tq * tk * 4             # exp'd scores + probs (f32)
        return q_b + k_b + v_b + o_b + acc_b + score_b

    fitting = []
    fallback = None
    for tq in tq_cands:
        for tk in tk_cands:
            fp = footprint(tq, tk)
            sqp, skp = _round_up(Sq, tq), _round_up(Sk, tk)
            if fp <= budget:
                # least padded work first, then larger tiles (fewer grid steps)
                fitting.append((sqp * skp, -tq, -tk, tq, tk, sqp, skp))
            if fallback is None or fp < fallback[0]:
                fallback = (fp, tq, tk, sqp, skp)
    if fitting:
        _, _, _, tq, tk, Sqp, Skp = min(fitting)
    else:
        _, tq, tk, Sqp, Skp = fallback
    return tq, tk, Dp, Dvp, Sqp, Skp


def _make_kernel(inv_scale):
    def _attention_kernel(q_ref, kt_ref, v_ref, o_ref, acc_ref, qs_ref):
        """One (Sq-tile, Sk-tile) grid step.

        Grid = (Sq//tq ['parallel'], Sk//tk ['arbitrary' reduction]).  The
        batch-dim softmax is elementwise in (i, j), so tiling the key axis with
        an f32 accumulator stays exact.
        """
        ki = pl.program_id(1)

        @pl.when(ki == 0)
        def _():
            acc_ref[...] = jnp.zeros_like(acc_ref)
            # Hoist the 1/sqrt(d) scale out of the ki loop: the q block is
            # resident across all Sk steps, so scale it once per qi block.
            qs_ref[...] = q_ref[...] * inv_scale

        # scores[b, i, j] = <q[b,i,:], k[b,j,:]> / sqrt(d).  K is fed
        # pre-transposed (B, D, tk): tk (multiple of 128) sits on the lane
        # axis, plain (non-transposed-RHS) MXU matmul, f32 accumulate.
        s = jnp.einsum("bqd,bdk->bqk", qs_ref[...], kt_ref[...],
                       preferred_element_type=jnp.float32)

        # F.softmax with implicit dim on a 3-D tensor -> softmax over dim 0
        # (batch).  Reciprocal goes to the EUP slot.
        s = jnp.exp(s - jnp.max(s, axis=0, keepdims=True))
        p = s * pl.reciprocal(jnp.sum(s, axis=0, keepdims=True), approx=True)

        # Dropout: eval-mode identity (see TODO at module top).

        # Second matmul fed in v's dtype; accumulate over the Sk grid axis in f32.
        acc_ref[...] += jnp.einsum("bqk,bkd->bqd", p.astype(v_ref.dtype),
                                   v_ref[...], preferred_element_type=jnp.float32)

        @pl.when(ki == pl.num_programs(1) - 1)
        def _():
            o_ref[...] = acc_ref[...].astype(o_ref.dtype)

    return _attention_kernel


def dot_product_attention(q, v, k, *,
                          vmem_budget_bytes=_VMEM_BUDGET_BYTES,
                          vmem_limit_bytes=_VMEM_LIMIT_BYTES):
    """Mirrors dotproductattention.forward(q, v, k) argument order."""
    B, Sq, D = q.shape
    Bk, Sk, Dk = k.shape
    Bv, Sv, Dv = v.shape
    assert B == Bk == Bv and D == Dk and Sk == Sv

    itemsize = jnp.dtype(q.dtype).itemsize
    tq, tk, Dp, Dvp, Sqp, Skp = _plan_tiles(B, Sq, Sk, D, Dv, itemsize,
                                            vmem_budget_bytes)

    # Zero-padding is semantically safe here:
    #  * padded Sk keys score 0 for every b -> batch-softmax weight 1/B, but
    #    they multiply zero-padded v rows, contributing exactly 0;
    #  * padded Sq rows / Dv columns are sliced off below;
    #  * padded D columns are zeros in both q and k (dot product unchanged;
    #    the 1/sqrt(d) scale uses the original d).
    qp = q if (Sqp == Sq and Dp == D) else jnp.pad(
        q, ((0, 0), (0, Sqp - Sq), (0, Dp - D)))
    kp = k if (Skp == Sk and Dp == D) else jnp.pad(
        k, ((0, 0), (0, Skp - Sk), (0, Dp - D)))
    kt = jnp.transpose(kp, (0, 2, 1))          # (B, Dp, Skp): keys on the lane axis
    vp = v if (Skp == Sk and Dvp == Dv) else jnp.pad(
        v, ((0, 0), (0, Skp - Sk), (0, Dvp - Dv)))

    grid = (Sqp // tq, Skp // tk)
    kernel = _make_kernel(1.0 / math.sqrt(D))

    out = pl.pallas_call(
        kernel,
        out_shape=jax.ShapeDtypeStruct((B, Sqp, Dvp), q.dtype),
        grid_spec=pltpu.PrefetchScalarGridSpec(
            num_scalar_prefetch=0,
            grid=grid,
            in_specs=[
                pl.BlockSpec((B, tq, Dp), lambda qi, ki: (0, qi, 0)),    # q
                pl.BlockSpec((B, Dp, tk), lambda qi, ki: (0, 0, ki)),    # k^T
                pl.BlockSpec((B, tk, Dvp), lambda qi, ki: (0, ki, 0)),   # v
            ],
            out_specs=pl.BlockSpec((B, tq, Dvp), lambda qi, ki: (0, qi, 0)),
            scratch_shapes=[
                pltpu.VMEM((B, tq, Dvp), jnp.float32),   # f32 accumulator
                pltpu.VMEM((B, tq, Dp), q.dtype),        # pre-scaled q block
            ],
        ),
        compiler_params=pltpu.CompilerParams(
            # Sq tiles are independent ('parallel' -> megacore sharding on v7x);
            # Sk is the reduction axis of the second matmul ('arbitrary').
            dimension_semantics=("parallel", "arbitrary"),
            vmem_limit_bytes=vmem_limit_bytes,
        ),
    )(qp, kt, vp)

    if Sqp != Sq or Dvp != Dv:
        out = out[:, :Sq, :Dv]
    return out


def _reference(q, v, k):
    d = q.shape[-1]
    scores = jnp.einsum("bqd,bkd->bqk", q, k) / math.sqrt(d)
    p = jax.nn.softmax(scores, axis=0)  # legacy implicit-dim rule (dim=0 for 3-D)
    return jnp.einsum("bqk,bkd->bqd", p, v)


if __name__ == "__main__":
    key = jax.random.PRNGKey(0)
    kq, kv, kk = jax.random.split(key, 3)

    # Small shape consistent with the module's bmm convention.
    B, Sq, Sk, D = 2, 8, 8, 32
    q = jax.random.normal(kq, (B, Sq, D), dtype=jnp.float32)
    v = jax.random.normal(kv, (B, Sk, D), dtype=jnp.float32)
    k = jax.random.normal(kk, (B, Sk, D), dtype=jnp.float32)

    out = jax.block_until_ready(dot_product_attention(q, v, k))
    ref = _reference(q, v, k)
    assert out.shape == (B, Sq, D)
    assert jnp.allclose(out, ref, atol=2e-2, rtol=2e-2), "mismatch vs JAX reference (small)"

    # Gridded case: awkward extents exercise Sq/Sk padding, the Sk-reduction
    # accumulator, >=2 parallel Sq blocks, and the Dv/D -> 128 padding path.
    B2, Sq2, Sk2, D2 = 2, 200, 300, 32
    kq2, kv2, kk2 = jax.random.split(jax.random.PRNGKey(0), 3)
    q2 = jax.random.normal(kq2, (B2, Sq2, D2), dtype=jnp.float32)
    v2 = jax.random.normal(kv2, (B2, Sk2, D2), dtype=jnp.float32)
    k2 = jax.random.normal(kk2, (B2, Sk2, D2), dtype=jnp.float32)

    out2 = jax.block_until_ready(dot_product_attention(q2, v2, k2))
    ref2 = _reference(q2, v2, k2)
    assert out2.shape == (B2, Sq2, D2)
    assert jnp.allclose(out2, ref2, atol=1e-1, rtol=5e-2), "mismatch vs JAX reference (gridded)"

    print("KERNEL_OK")
</pallas_src>

<mosaic_0001>
module attributes {stable_mosaic.version = 11 : i64} {
  func.func @_attention_kernel(%arg0: i32, %arg1: i32, %arg2: memref<2x8x128xf32, #tpu.memory_space<vmem>>, %arg3: memref<2x128x8xf32, #tpu.memory_space<vmem>>, %arg4: memref<2x8x128xf32, #tpu.memory_space<vmem>>, %arg5: memref<2x8x128xf32, #tpu.memory_space<vmem>>, %arg6: memref<2x8x128xf32, #tpu.memory_space<vmem>>, %arg7: memref<2x8x128xf32, #tpu.memory_space<vmem>>) attributes {dimension_semantics = [#tpu.dimension_semantics<parallel>, #tpu.dimension_semantics<arbitrary>], iteration_bounds = array<i64: 1, 1>, scalar_prefetch = 0 : i64, scratch_operands = 2 : i64, tpu.core_type = #tpu.core_type<tc>, window_params = [{transform_indices = @transform_0, window_bounds = array<i64: 2, 8, 128>}, {transform_indices = @transform_1, window_bounds = array<i64: 2, 128, 8>}, {transform_indices = @transform_2, window_bounds = array<i64: 2, 8, 128>}, {transform_indices = @transform_3, window_bounds = array<i64: 2, 8, 128>}]} {
    %c0_i32 = arith.constant 0 : i32
    %0 = arith.cmpi eq, %arg1, %c0_i32 : i32
    %1 = arith.extui %0 : i1 to i32
    %c0_i32_0 = arith.constant 0 : i32
    %2 = arith.cmpi ne, %1, %c0_i32_0 : i32
    scf.if %2 {
      %cst_20 = arith.constant 0.000000e+00 : f32
      %24 = vector.broadcast %cst_20 : f32 to vector<2x8x128xf32>
      %c0_21 = arith.constant 0 : index
      %c0_22 = arith.constant 0 : index
      %c0_23 = arith.constant 0 : index
      %25 = vector.load %arg6[%c0_21, %c0_22, %c0_23] : memref<2x8x128xf32, #tpu.memory_space<vmem>>, vector<2x8x128xf32>
      tpu.vector_store %arg6[%c0_21, %c0_22, %c0_23], %24 {strides = array<i32>} : memref<2x8x128xf32, #tpu.memory_space<vmem>>, vector<2x8x128xf32>,
      %c0_24 = arith.constant 0 : index
      %c0_25 = arith.constant 0 : index
      %c0_26 = arith.constant 0 : index
      %26 = vector.load %arg2[%c0_24, %c0_25, %c0_26] : memref<2x8x128xf32, #tpu.memory_space<vmem>>, vector<2x8x128xf32>
      %cst_27 = arith.constant 0.176776692 : f32
      %27 = vector.broadcast %cst_27 : f32 to vector<2x8x128xf32>
      %28 = arith.mulf %26, %27 : vector<2x8x128xf32>
      %c0_28 = arith.constant 0 : index
      %c0_29 = arith.constant 0 : index
      %c0_30 = arith.constant 0 : index
      %29 = vector.load %arg7[%c0_28, %c0_29, %c0_30] : memref<2x8x128xf32, #tpu.memory_space<vmem>>, vector<2x8x128xf32>
      tpu.vector_store %arg7[%c0_28, %c0_29, %c0_30], %28 {strides = array<i32>} : memref<2x8x128xf32, #tpu.memory_space<vmem>>, vector<2x8x128xf32>,
    } else {
    }
    %c0 = arith.constant 0 : index
    %c0_1 = arith.constant 0 : index
    %c0_2 = arith.constant 0 : index
    %3 = vector.load %arg7[%c0, %c0_1, %c0_2] : memref<2x8x128xf32, #tpu.memory_space<vmem>>, vector<2x8x128xf32>
    %c0_3 = arith.constant 0 : index
    %c0_4 = arith.constant 0 : index
    %c0_5 = arith.constant 0 : index
    %4 = vector.load %arg3[%c0_3, %c0_4, %c0_5] : memref<2x128x8xf32, #tpu.memory_space<vmem>>, vector<2x128x8xf32>
    "tpu.trace_start"() <{level = 10 : i32, message = "bqd,bdk->bqk"}> : () -> ()
    %cst = arith.constant dense<0.000000e+00> : vector<2x8x8xf32>
    %5 = tpu.matmul %3, %4, %cst {dimension_numbers = #tpu.dot_dimension_numbers<[2], [1], [1], [2], [0, 0, 0, 1, 1, 2], [0], [0]>} : vector<2x8x128xf32>, vector<2x128x8xf32>, vector<2x8x8xf32> -> vector<2x8x8xf32>
    "tpu.trace_stop"() : () -> ()
    %cst_6 = arith.constant dense<0xFF800000> : vector<8x8xf32>
    %6 = vector.multi_reduction <maximumf>, %5, %cst_6 [0] : vector<2x8x8xf32> to vector<8x8xf32>
    %7 = vector.shape_cast %6 : vector<8x8xf32> to vector<1x8x8xf32>
    %8 = vector.broadcast %7 : vector<1x8x8xf32> to vector<2x8x8xf32>
    %9 = arith.subf %5, %8 : vector<2x8x8xf32>
    %10 = math.exp %9 : vector<2x8x8xf32>
    %cst_7 = arith.constant dense<0.000000e+00> : vector<8x8xf32>
    %11 = vector.multi_reduction <add>, %10, %cst_7 [0] : vector<2x8x8xf32> to vector<8x8xf32>
    %12 = vector.shape_cast %11 : vector<8x8xf32> to vector<1x8x8xf32>
    %13 = tpu.reciprocal %12 {approx = true} : vector<1x8x8xf32> -> vector<1x8x8xf32>
    %14 = vector.broadcast %13 : vector<1x8x8xf32> to vector<2x8x8xf32>
    %15 = arith.mulf %10, %14 : vector<2x8x8xf32>
    %c0_8 = arith.constant 0 : index
    %c0_9 = arith.constant 0 : index
    %c0_10 = arith.constant 0 : index
    %16 = vector.load %arg6[%c0_8, %c0_9, %c0_10] : memref<2x8x128xf32, #tpu.memory_space<vmem>>, vector<2x8x128xf32>
    %c0_11 = arith.constant 0 : index
    %c0_12 = arith.constant 0 : index
    %c0_13 = arith.constant 0 : index
    %17 = vector.load %arg4[%c0_11, %c0_12, %c0_13] : memref<2x8x128xf32, #tpu.memory_space<vmem>>, vector<2x8x128xf32>
    "tpu.trace_start"() <{level = 10 : i32, message = "bqk,bkd->bqd"}> : () -> ()
    %cst_14 = arith.constant dense<0.000000e+00> : vector<2x8x128xf32>
    %18 = tpu.matmul %15, %17, %cst_14 {dimension_numbers = #tpu.dot_dimension_numbers<[2], [1], [1], [2], [0, 0, 0, 1, 1, 2], [0], [0]>} : vector<2x8x8xf32>, vector<2x8x128xf32>, vector<2x8x128xf32> -> vector<2x8x128xf32>
    "tpu.trace_stop"() : () -> ()
    %19 = arith.addf %16, %18 : vector<2x8x128xf32>
    %c0_15 = arith.constant 0 : index
    %c0_16 = arith.constant 0 : index
    %c0_17 = arith.constant 0 : index
    %20 = vector.load %arg6[%c0_15, %c0_16, %c0_17] : memref<2x8x128xf32, #tpu.memory_space<vmem>>, vector<2x8x128xf32>
    tpu.vector_store %arg6[%c0_15, %c0_16, %c0_17], %19 {strides = array<i32>} : memref<2x8x128xf32, #tpu.memory_space<vmem>>, vector<2x8x128xf32>,
    %c0_i32_18 = arith.constant 0 : i32
    %21 = arith.cmpi eq, %arg1, %c0_i32_18 : i32
    %22 = arith.extui %21 : i1 to i32
    %c0_i32_19 = arith.constant 0 : i32
    %23 = arith.cmpi ne, %22, %c0_i32_19 : i32
    scf.if %23 {
      %c0_20 = arith.constant 0 : index
      %c0_21 = arith.constant 0 : index
      %c0_22 = arith.constant 0 : index
      %24 = vector.load %arg6[%c0_20, %c0_21, %c0_22] : memref<2x8x128xf32, #tpu.memory_space<vmem>>, vector<2x8x128xf32>
      %c0_23 = arith.constant 0 : index
      %c0_24 = arith.constant 0 : index
      %c0_25 = arith.constant 0 : index
      %25 = vector.load %arg5[%c0_23, %c0_24, %c0_25] : memref<2x8x128xf32, #tpu.memory_space<vmem>>, vector<2x8x128xf32>
      tpu.vector_store %arg5[%c0_23, %c0_24, %c0_25], %24 {strides = array<i32>} : memref<2x8x128xf32, #tpu.memory_space<vmem>>, vector<2x8x128xf32>,
    } else {
    }
    return
  }
  func.func @transform_0(%arg0: i32, %arg1: i32) -> (i32, i32, i32) {
    %c0_i32 = arith.constant 0 : i32
    %c0_i32_0 = arith.constant 0 : i32
    %c0_i32_1 = arith.constant 0 : i32
    return %c0_i32, %arg0, %c0_i32_0 : i32, i32, i32
  }
  func.func @transform_1(%arg0: i32, %arg1: i32) -> (i32, i32, i32) {
    %c0_i32 = arith.constant 0 : i32
    %c0_i32_0 = arith.constant 0 : i32
    %c0_i32_1 = arith.constant 0 : i32
    return %c0_i32, %c0_i32_0, %arg1 : i32, i32, i32
  }
  func.func @transform_2(%arg0: i32, %arg1: i32) -> (i32, i32, i32) {
    %c0_i32 = arith.constant 0 : i32
    %c0_i32_0 = arith.constant 0 : i32
    %c0_i32_1 = arith.constant 0 : i32
    return %c0_i32, %arg1, %c0_i32_0 : i32, i32, i32
  }
  func.func @transform_3(%arg0: i32, %arg1: i32) -> (i32, i32, i32) {
    %c0_i32 = arith.constant 0 : i32
    %c0_i32_0 = arith.constant 0 : i32
    %c0_i32_1 = arith.constant 0 : i32
    return %c0_i32, %arg0, %c0_i32_0 : i32, i32, i32
  }
}

</mosaic_0001>

<bundles_post_ra>
// kernel: tpu_custom_call.1
= control target key start
LH: loop header
LB: loop body
LE: loop exit
PB: predicated region body
PF: predicated region fallthrough
CT: control target
= control target key end

     0   :  { %v598_v3 = vmov 0.0|0.0   ;;  %vm599_vm0 = vmmov 0   ;;  %v600_v11 = vmov 0.0   ;;  %s776_s0 = inlined_call_operand.vmem [shape: f32[2,8,128], index: 0, kind: input, shape index: {}]   ;;  %s777_s1 = inlined_call_operand.vmem [shape: f32[2,128,8], index: 1, kind: input, shape index: {}]   ;;  %s778_s2 = inlined_call_operand.vmem [shape: f32[2,8,128], index: 2, kind: input, shape index: {}]   ;;  %s779_s3 = inlined_call_operand.hbm [shape: f32[2,8,128], index: 3, kind: output, shape index: {}]  }
   0x1   :  { %v29_v0 = vld [vmem:[%s777_s1] sm:$0xff]  ;;  %v30_v1 = vld [vmem:[%s777_s1 + $0x8] sm:$0xff]  ;;  %514 = vmatprep.subr.bf16.mxu0 %v598_v3  ;;  %538 = vmatprep.subr.bf16.mxu1 %v598_v3  ;;  %v31_v6 = vld [vmem:[%s777_s1 + $0x10] sm:$0xff] }
   0x2   :  { %v45_v2 = vld [vmem:[%s777_s1 + $0x80] sm:$0xff]  ;;  %v515_v4 = vpack.c.bf16 %v30_v1, %v29_v0  ;;  %v46_v5 = vld [vmem:[%s777_s1 + $0x88] sm:$0xff]  ;;  %v32_v7 = vld [vmem:[%s777_s1 + $0x18] sm:$0xff]  ;;  %466 = vmatprep.mubr.msk.f32.mxu0 %vm599_vm0, %v600_v11  ;;  %501 = vmatprep.mubr.msk.f32.mxu1 %vm599_vm0, %v600_v11 }
   0x3   :  { %v539_v8 = vpack.c.bf16 %v46_v5, %v45_v2  ;;  %v47_v9 = vld [vmem:[%s777_s1 + $0x90] sm:$0xff]  ;;  %v48_v10 = vld [vmem:[%s777_s1 + $0x98] sm:$0xff]  ;;  %v518_v12 = vpack.c.bf16 %v32_v7, %v31_v6  ;;  %v33_v14 = vld [vmem:[%s777_s1 + $0x20] sm:$0xff] }
   0x4   :  { %516 = vmatpush3.bf16.msra.mxu0 %v515_v4  ;;  %v542_v13 = vpack.c.bf16 %v48_v10, %v47_v9  ;;  %v34_v15 = vld [vmem:[%s777_s1 + $0x28] sm:$0xff]  ;;  %v49_v16 = vld [vmem:[%s777_s1 + $0xa0] sm:$0xff]  ;;  %v35_v20 = vld [vmem:[%s777_s1 + $0x30] sm:$0xff] }
   0x5   :  { %540 = vmatpush3.bf16.msra.mxu1 %v539_v8  ;;  %517 = vmatprep.subr.bf16.mxu0 %v598_v3  ;;  %v50_v17 = vld [vmem:[%s777_s1 + $0xa8] sm:$0xff]  ;;  %v521_v18 = vpack.c.bf16 %v34_v15, %v33_v14  ;;  %v36_v21 = vld [vmem:[%s777_s1 + $0x38] sm:$0xff]  ;;  %v51_v22 = vld [vmem:[%s777_s1 + $0xb0] sm:$0xff] }
   0x6   :  { %541 = vmatprep.subr.bf16.mxu1 %v598_v3  ;;  %v545_v19 = vpack.c.bf16 %v50_v17, %v49_v16  ;;  %v52_v23 = vld [vmem:[%s777_s1 + $0xb8] sm:$0xff]  ;;  %v524_v24 = vpack.c.bf16 %v36_v21, %v35_v20 }
   0x8   :  { %519 = vmatpush3.bf16.msra.mxu0 %v518_v12 }
   0x9   :  { %543 = vmatpush3.bf16.msra.mxu1 %v542_v13  ;;  %520 = vmatprep.subr.bf16.mxu0 %v598_v3 }
   0xa   :  { %544 = vmatprep.subr.bf16.mxu1 %v598_v3 }
   0xc   :  { %522 = vmatpush3.bf16.msra.mxu0 %v521_v18 }
   0xd   :  { %8 = vsyncpa [#allocation5], 0  ;;  %546 = vmatpush3.bf16.msra.mxu1 %v545_v19  ;;  %523 = vmatprep.subr.bf16.mxu0 %v598_v3  ;;  %v548_v25 = vpack.c.bf16 %v52_v23, %v51_v22  ;;  %v37_v26 = vld [vmem:[%s777_s1 + $0x40] sm:$0xff]  ;;  %v38_v27 = vld [vmem:[%s777_s1 + $0x48] sm:$0xff]  ;;  %vm201_vm1 = vcmask 64512  }
   0xe   :  { %547 = vmatprep.subr.bf16.mxu1 %v598_v3  ;;  %v53_v28 = vld [vmem:[%s777_s1 + $0xc0] sm:$0xff]  ;;  %v54_v29 = vld [vmem:[%s777_s1 + $0xc8] sm:$0xff]  ;;  %v527_v30 = vpack.c.bf16 %v38_v27, %v37_v26  ;;  %v39_v32 = vld [vmem:[%s777_s1 + $0x50] sm:$0xff] }
   0xf   :  { %v551_v31 = vpack.c.bf16 %v54_v29, %v53_v28  ;;  %v40_v33 = vld [vmem:[%s777_s1 + $0x58] sm:$0xff]  ;;  %v55_v34 = vld [vmem:[%s777_s1 + $0xd0] sm:$0xff]  ;;  %v41_v38 = vld [vmem:[%s777_s1 + $0x60] sm:$0xff] }
  0x10   :  { %525 = vmatpush3.bf16.msra.mxu0 %v524_v24  ;;  %v56_v35 = vld [vmem:[%s777_s1 + $0xd8] sm:$0xff]  ;;  %v530_v36 = vpack.c.bf16 %v40_v33, %v39_v32  ;;  %v42_v39 = vld [vmem:[%s777_s1 + $0x68] sm:$0xff]  ;;  %v57_v40 = vld [vmem:[%s777_s1 + $0xe0] sm:$0xff] }
  0x11   :  { %549 = vmatpush3.bf16.msra.mxu1 %v548_v25  ;;  %526 = vmatprep.subr.bf16.mxu0 %v598_v3  ;;  %v554_v37 = vpack.c.bf16 %v56_v35, %v55_v34  ;;  %v58_v41 = vld [vmem:[%s777_s1 + $0xe8] sm:$0xff]  ;;  %v533_v42 = vpack.c.bf16 %v42_v39, %v41_v38  ;;  %v43_v44 = vld [vmem:[%s777_s1 + $0x70] sm:$0xff]  ;;  %v44_v45 = vld [vmem:[%s777_s1 + $0x78] sm:$0xff] }
  0x12   :  { %550 = vmatprep.subr.bf16.mxu1 %v598_v3  ;;  %v557_v43 = vpack.c.bf16 %v58_v41, %v57_v40  ;;  %v59_v46 = vld [vmem:[%s777_s1 + $0xf0] sm:$0xff]  ;;  %v60_v47 = vld [vmem:[%s777_s1 + $0xf8] sm:$0xff]  ;;  %v536_v48 = vpack.c.bf16 %v44_v45, %v43_v44  ;;  %v21_v49 = vld [vmem:[%s776_s0] sm:$0xff] }
  0x13   :  { %v560_v50 = vpack.c.bf16 %v60_v47, %v59_v46  ;;  %v22_v51 = vld [vmem:[%s776_s0 + $0x8] sm:$0xff]  ;;  %v23_v52 = vmul.f32 0.17677669, %v21_v49  ;;  %v219_v54 = vld [vmem:[%s778_s2] sm:$0xff] }
  0x14   :  { %528 = vmatpush3.bf16.msra.mxu0 %v527_v30  ;;  %v24_v53 = vmul.f32 0.17677669, %v22_v51  ;;  %v220_v55 = vld [vmem:[%s778_s2 + $0x8] sm:$0xff]  ;;  %s601_s2 = smov [#allocation4]  }
  0x15   :  { %552 = vmatpush3.bf16.msra.mxu1 %v551_v31  ;;  %529 = vmatprep.subr.bf16.mxu0 %v598_v3  ;;  %s383_s28 = sshll.u32 %s601_s2, 4  ;;  %s384_s28 = int_to_ptr.vmem [resolvable:$true] %s383_s28 }
  0x16   :  { %553 = vmatprep.subr.bf16.mxu1 %v598_v3  ;;  %s574_s29 = scalar_lea.vmem %s384_s28, 256  ;;  %p579_p1 = scmp.lt.s32.totalorder %s384_s28, %s384_s28 }
  0x17   :  { %p575_p0 = scmp.ne.s32.totalorder %s384_s28, %s574_s29  ;;  %p580_p2 = scmp.lt.s32.totalorder %s574_s29, %s574_s29 }
  0x18   :  { %531 = vmatpush3.bf16.msra.mxu0 %v530_v36 }
  0x19   :  { %555 = vmatpush3.bf16.msra.mxu1 %v554_v37  ;;  %532 = vmatprep.subr.bf16.mxu0 %v598_v3  ;;  %p581_p3 = por %p580_p2, %p579_p1 }
  0x1a   :  { %556 = vmatprep.subr.bf16.mxu1 %v598_v3 }
  0x1b   :  { %p582_p4 = pnand %p581_p3, %p575_p0 }
  0x1c   :  { %534 = vmatpush3.bf16.msra.mxu0 %v533_v42 }
  0x1d   :  { %558 = vmatpush3.bf16.msra.mxu1 %v557_v43  ;;  %535 = vmatprep.subr.bf16.mxu0 %v598_v3 }
  0x1e   :  { %559 = vmatprep.subr.bf16.mxu1 %v598_v3 }
  0x20   :  { %537 = vmatpush3.bf16.msra.mxu0 %v536_v48 }
  0x21   :  { %561 = vmatpush3.bf16.msra.mxu1 %v560_v50  ;;  %504 = vmatprep.subr.mxu0 %v600_v11 }
  0x22   :  { %509 = vmatprep.subr.mxu1 %v600_v11 }
  0x23   :  { %467 = vmatmul.mubr.f32.vlgmr.msra.gmra.mrb[0].mxu0 %v23_v52 }
  0x24   :  { %502 = vmatmul.mubr.f32.vlgmr.msra.gmra.mrb[0].mxu1 %v24_v53  ;;  %506 = vmatprep.mubr.msk.f32.mxu0 %vm599_vm0, %v600_v11 }
  0x25   :  { %511 = vmatprep.mubr.msk.f32.mxu1 %vm599_vm0, %v600_v11  ;;  %505 = vmatpush3.msra.mxu0 %v219_v54 }
  0x26   :  { %510 = vmatpush3.msra.mxu1 %v220_v55 }
  0xf6   :  { %v127_v56 = vpop.f32.mrb[0].mxu0 }
  0xf7   :  { %v202_v57 = vsel %vm201_vm1, %v127_v56, -inf  ;;  %v197_v58 = vpop.f32.mrb[0].mxu1  ;;  %v468_v59 = vpop.f32.mrb[1].mxu0 }
  0xf8   :  { %v203_v60 = vsel %vm201_vm1, %v197_v58, -inf  ;;  %v503_v61 = vpop.f32.mrb[1].mxu1 }
  0xf9   :  { %v204_v62 = vmax.f32 %v202_v57, %v203_v60 }
  0xfb   :  { %v205_v63 = vsub.f32 %v127_v56, %v204_v62  ;;  %v206_v0 = vsub.f32 %v197_v58, %v204_v62 }
  0xfd   :  { %v207_v1 = vmul.f32 1.442695, %v205_v63  ;;  %v209_v2 = vmul.f32 1.442695, %v206_v0 }
  0xff   :  { %568 = vpow2.f32 %v207_v1 }
 0x100   :  { %570 = vpow2.f32 %v209_v2 }
 0x109   :  { %v569_v3 = vpop.eup %568 }
 0x10a   :  { %v571_v4 = vpop.eup %570  ;;  %v211_v5 = vsel %vm201_vm1, %v569_v3, 0.0 }
 0x10b   :  { %v212_v6 = vsel %vm201_vm1, %v571_v4, 0.0 }
 0x10c   :  { %v213_v7 = vadd.f32 %v212_v6, %v211_v5 }
 0x10e   :  { %572 = vrcp.f32 %v213_v7 }
 0x118   :  { %v573_v8 = vpop.eup %572 }
 0x119   :  { %v215_v9 = vmul.f32 %v573_v8, %v569_v3  ;;  %v216_v10 = vmul.f32 %v573_v8, %v571_v4 }
 0x11b   :  { %507 = vmatmul.mubr.msk.f32.vlgmr.msra.gmra.mrb[2].mxu0 %vm201_vm1, %v215_v9  ;;  %512 = vmatmul.mubr.msk.f32.vlgmr.msra.gmra.mrb[2].mxu1 %vm201_vm1, %v216_v10 }
 0x1ee   :  { %v290_v11 = vpop.f32.mrb[2].mxu0  ;;  %v363_v12 = vpop.f32.mrb[2].mxu1 }
 0x1ef   :  { %376 = vst [vmem:[#allocation4] sm:$0xff] %v290_v11  ;;  %377 = vst [vmem:[#allocation4 + $0x8] sm:$0xff] %v363_v12  ;;  %v508_v13 = vpop.f32.mrb[3].mxu0  ;;  %v513_v14 = vpop.f32.mrb[3].mxu1 }
 0x1f0   :  { %585 = shalt.err (!%p582_p4)
}
 0x1f1   :  { %s586_s5 = scalar_lea.hbm %s779_s3, 256 }
 0x1f2   :  { %p587_p5 = scmp.ne.s32.totalorder %s779_s3, %s586_s5  ;;  %p590_p6 = scmp.lt.u32.totalorder %s586_s5, %s779_s3 }
 0x1f4   :  { %p592_p7 = pnand %p590_p6, %p587_p5 }
 0x1f6   :  { %595 = shalt.err (!%p592_p7)
}
 0x1f7   :  { %s602_s10 = smov 128   ;;  %s603_s11 = smov 8  }
 0x1f8   :  { %389 = dma.vmem_to_hbm [thread:$0]  %s384_s28, 256, %s779_s3, [#allocation5], %s602_s10, %s602_s10, %s603_s11  }
 0x1f9   :  { %596 = dma.done.wait [#allocation5], 256  }
 0x1fa   :  { %597 = vsyncadd [#allocation5], 4294967040 }
 0x1fb   :  { %393 = vsyncpa [#allocation5], 1 }

</bundles_post_ra>
